<compile_context>
chip_gen: v7x
topology: tpu7x:2x2x1
jax: 0.10.0
libtpu: 0.0.40
codegen_flags: <defaults>
</compile_context>

<pallas_src>
import jax
import jax.numpy as jnp
import numpy as np
from jax.experimental import pallas as pl
from jax.experimental.pallas import tpu as pltpu


def _bond_order_edge_kernel(edge_ref, gate_ref, w_ref, out_ref):
    # edge_ref: (tile_e, F)    streaming edge features (f32 or bf16)
    # gate_ref: (OUT, tile_e)  f32, = e_src[u] + e_dst[v] + b_edge (precomputed)
    # w_ref:    (OUT, F)       resident edge-gate weight (PyTorch layout)
    # out_ref:  (OUT, tile_e)  f32
    #
    # m[o, e] = sum_f w[o, f] * edge[e, f]   -- single A @ B^T GEMM on the MXU,
    # f32 accumulation, result already lane-dense along the edge axis.
    m = jax.lax.dot_general(
        w_ref[...], edge_ref[...],
        dimension_numbers=(((1,), (1,)), ((), ())),
        preferred_element_type=jnp.float32)
    out_ref[...] = jax.nn.sigmoid(m + gate_ref[...]).astype(out_ref.dtype)


def bond_order_conv(node_feats, edge_feats, src_idx, dst_idx,
                    w_src, b_src, w_dst, b_dst, w_edge, b_edge,
                    *, tile_e=1024, compute_dtype=None):
    """Pallas implementation of BondOrderConv.forward.

    node_feats: (N, F) float32
    edge_feats: (E, F) float32
    src_idx, dst_idx: (E,) int32 edge endpoints (u -> v)
    w_*: (OUT, F) float32 (PyTorch nn.Linear weight layout), b_*: (OUT,)
    compute_dtype: dtype for the streamed edge features / edge weight
                   (e.g. jnp.bfloat16); accumulation stays float32.
    returns: (E, OUT) float32 sigmoid bond-order scores
    """
    E, F = edge_feats.shape
    OUT = w_src.shape[0]
    assert tile_e % 128 == 0, "tile_e must be a multiple of 128 (lane width)"
    if compute_dtype is None:
        compute_dtype = edge_feats.dtype
    f32 = jnp.float32

    # --- node-level gates: tiny (N, F) matmuls, plain XLA glue --------------
    e_src = node_feats.astype(f32) @ w_src.astype(f32).T + b_src.astype(f32)
    e_dst = node_feats.astype(f32) @ w_dst.astype(f32).T + b_dst.astype(f32)
    # Per-edge gate with the edge bias pre-summed; transposed so edges sit on
    # the lane axis inside the kernel.  Only OUT floats per edge are streamed.
    gate = (jnp.take(e_src, src_idx, axis=0)
            + jnp.take(e_dst, dst_idx, axis=0)
            + b_edge.astype(f32))                       # (E, OUT)
    gate_t = gate.T                                     # (OUT, E)

    # --- pad the edge dimension up to a multiple of tile_e ------------------
    num_tiles = pl.cdiv(E, tile_e)
    e_pad = num_tiles * tile_e
    if e_pad != E:
        edge_feats = jnp.pad(edge_feats, ((0, e_pad - E), (0, 0)))
        gate_t = jnp.pad(gate_t, ((0, 0), (0, e_pad - E)))

    edge_feats = edge_feats.astype(compute_dtype)
    w_edge_c = w_edge.astype(compute_dtype)

    out_t = pl.pallas_call(
        _bond_order_edge_kernel,
        out_shape=jax.ShapeDtypeStruct((OUT, e_pad), f32),
        grid_spec=pltpu.PrefetchScalarGridSpec(
            num_scalar_prefetch=0,
            grid=(num_tiles,),
            in_specs=[
                pl.BlockSpec((tile_e, F), lambda i: (i, 0)),    # edge features
                pl.BlockSpec((OUT, tile_e), lambda i: (0, i)),  # per-edge gate
                pl.BlockSpec((OUT, F), lambda i: (0, 0)),       # W_edge (resident)
            ],
            out_specs=pl.BlockSpec((OUT, tile_e), lambda i: (0, i)),
        ),
        compiler_params=pltpu.CompilerParams(
            # Single independent edge axis -> shards across v7x's 2 TensorCores.
            dimension_semantics=("parallel",),
            # Footprint is < 2 MiB even at tile_e=8192; 32 MiB is safe on
            # v5e/v6e (128 MiB physical) and v7x (64 MiB physical).
            vmem_limit_bytes=32 * 1024 * 1024,
        ),
    )(edge_feats, gate_t, w_edge_c)

    return out_t[:, :E].T                               # (E, OUT)


def _reference(node_feats, edge_feats, src_idx, dst_idx,
               w_src, b_src, w_dst, b_dst, w_edge, b_edge):
    e_src = node_feats @ w_src.T + b_src
    e_dst = node_feats @ w_dst.T + b_dst
    m = e_src[src_idx] + e_dst[dst_idx] + (edge_feats @ w_edge.T + b_edge)
    return jax.nn.sigmoid(m)


if __name__ == "__main__":
    # Small synthetic graph: 16 nodes, 300 edges (not a tile multiple -> tests
    # the padding path), 32 input features, 1 output (scalar bond order).
    N_NODES, N_EDGES, F, OUT = 16, 300, 32, 1

    key = jax.random.PRNGKey(0)
    (k_node, k_edge, k_src, k_dst,
     k_w1, k_b1, k_w2, k_b2, k_w3, k_b3) = jax.random.split(key, 10)

    node_feats = jax.random.normal(k_node, (N_NODES, F), dtype=jnp.float32)
    edge_feats = jax.random.normal(k_edge, (N_EDGES, F), dtype=jnp.float32)
    src_idx = jax.random.randint(k_src, (N_EDGES,), 0, N_NODES, dtype=jnp.int32)
    dst_idx = jax.random.randint(k_dst, (N_EDGES,), 0, N_NODES, dtype=jnp.int32)

    # PyTorch nn.Linear layout: weight (OUT, F), bias (OUT,).
    bound = 1.0 / np.sqrt(F)
    def init_linear(kw, kb):
        w = jax.random.uniform(kw, (OUT, F), jnp.float32, -bound, bound)
        b = jax.random.uniform(kb, (OUT,), jnp.float32, -bound, bound)
        return w, b

    w_src, b_src = init_linear(k_w1, k_b1)
    w_dst, b_dst = init_linear(k_w2, k_b2)
    w_edge, b_edge = init_linear(k_w3, k_b3)
    params = (w_src, b_src, w_dst, b_dst, w_edge, b_edge)

    y_ref = _reference(node_feats, edge_feats, src_idx, dst_idx, *params)

    # 1) f32 path with a small tile -> exercises multi-tile grid + edge padding.
    y32 = bond_order_conv(node_feats, edge_feats, src_idx, dst_idx, *params,
                          tile_e=128)
    y32 = jax.block_until_ready(y32)
    np.testing.assert_allclose(np.asarray(y32), np.asarray(y_ref),
                               rtol=1e-5, atol=1e-5)

    # 2) bf16 streaming path with the production-sized tile (f32 accumulation).
    ybf = bond_order_conv(node_feats, edge_feats, src_idx, dst_idx, *params,
                          tile_e=1024, compute_dtype=jnp.bfloat16)
    ybf = jax.block_until_ready(ybf)
    np.testing.assert_allclose(np.asarray(ybf), np.asarray(y_ref),
                               rtol=0.0, atol=3e-2)

    print("KERNEL_OK")
</pallas_src>

<mosaic_0001>
module attributes {stable_mosaic.version = 11 : i64} {
  func.func @_bond_order_edge_kernel(%arg0: i32, %arg1: memref<128x32xf32, #tpu.memory_space<vmem>>, %arg2: memref<1x128xf32, #tpu.memory_space<vmem>>, %arg3: memref<1x32xf32, #tpu.memory_space<vmem>>, %arg4: memref<1x128xf32, #tpu.memory_space<vmem>>) attributes {dimension_semantics = [#tpu.dimension_semantics<parallel>], iteration_bounds = array<i64: 3>, scalar_prefetch = 0 : i64, scratch_operands = 0 : i64, tpu.core_type = #tpu.core_type<tc>, window_params = [{transform_indices = @transform_0, window_bounds = array<i64: 128, 32>}, {transform_indices = @transform_1, window_bounds = array<i64: 1, 128>}, {pipeline_mode = #tpu.pipeline_mode<synchronous>, transform_indices = @transform_2, window_bounds = array<i64: 1, 32>}, {transform_indices = @transform_3, window_bounds = array<i64: 1, 128>}]} {
    %c0 = arith.constant 0 : index
    %c0_0 = arith.constant 0 : index
    %0 = vector.load %arg3[%c0, %c0_0] : memref<1x32xf32, #tpu.memory_space<vmem>>, vector<1x32xf32>
    %c0_1 = arith.constant 0 : index
    %c0_2 = arith.constant 0 : index
    %1 = vector.load %arg1[%c0_1, %c0_2] : memref<128x32xf32, #tpu.memory_space<vmem>>, vector<128x32xf32>
    %cst = arith.constant dense<0.000000e+00> : vector<1x128xf32>
    %2 = tpu.matmul %0, %1, %cst {dimension_numbers = #tpu.dot_dimension_numbers<[1], [1], [0], [0], [0, 0, 1, 0], [], []>} : vector<1x32xf32>, vector<128x32xf32>, vector<1x128xf32> -> vector<1x128xf32>
    %c0_3 = arith.constant 0 : index
    %c0_4 = arith.constant 0 : index
    %3 = vector.load %arg2[%c0_3, %c0_4] : memref<1x128xf32, #tpu.memory_space<vmem>>, vector<1x128xf32>
    %4 = arith.addf %2, %3 : vector<1x128xf32>
    %5 = arith.negf %4 : vector<1x128xf32>
    %6 = math.exp %5 : vector<1x128xf32>
    %cst_5 = arith.constant 1.000000e+00 : f32
    %7 = vector.broadcast %cst_5 : f32 to vector<1x128xf32>
    %8 = arith.addf %7, %6 : vector<1x128xf32>
    %9 = arith.divf %7, %8 : vector<1x128xf32>
    %c0_6 = arith.constant 0 : index
    %c0_7 = arith.constant 0 : index
    %10 = vector.load %arg4[%c0_6, %c0_7] : memref<1x128xf32, #tpu.memory_space<vmem>>, vector<1x128xf32>
    tpu.vector_store %arg4[%c0_6, %c0_7], %9 {strides = array<i32>} : memref<1x128xf32, #tpu.memory_space<vmem>>, vector<1x128xf32>,
    return
  }
  func.func @transform_0(%arg0: i32) -> (i32, i32) {
    %c0_i32 = arith.constant 0 : i32
    %c0_i32_0 = arith.constant 0 : i32
    return %arg0, %c0_i32 : i32, i32
  }
  func.func @transform_1(%arg0: i32) -> (i32, i32) {
    %c0_i32 = arith.constant 0 : i32
    %c0_i32_0 = arith.constant 0 : i32
    return %c0_i32, %arg0 : i32, i32
  }
  func.func @transform_2(%arg0: i32) -> (i32, i32) {
    %c0_i32 = arith.constant 0 : i32
    %c0_i32_0 = arith.constant 0 : i32
    %c0_i32_1 = arith.constant 0 : i32
    return %c0_i32, %c0_i32_0 : i32, i32
  }
  func.func @transform_3(%arg0: i32) -> (i32, i32) {
    %c0_i32 = arith.constant 0 : i32
    %c0_i32_0 = arith.constant 0 : i32
    return %c0_i32, %arg0 : i32, i32
  }
}

</mosaic_0001>

<bundles_post_ra>
// kernel: tpu_custom_call.1
= control target key start
LH: loop header
LB: loop body
LE: loop exit
PB: predicated region body
PF: predicated region fallthrough
CT: control target
= control target key end

     0   :  { %8 = vsyncpa [#allocation3], 0  ;;  %s805_s0 = inlined_call_operand.vmem [shape: f32[384,32], index: 0, kind: input, shape index: {}]   ;;  %s806_s1 = inlined_call_operand.vmem [shape: f32[1,384], index: 1, kind: input, shape index: {}]   ;;  %s807_s2 = inlined_call_operand.vmem [shape: f32[1,32], index: 2, kind: input, shape index: {}]   ;;  %s808_s3 = inlined_call_operand.hbm [shape: f32[1,384], index: 3, kind: output, shape index: {}]  }
   0x1   :  { %10 = vsyncpa [#allocation3 + $0x1], 0  ;;  %s653_s12 = smov 0   ;;  %s655_s13 = smov 0  }
   0x2   :  { %s657_s14 = smov 0   ;;  %s659_s15 = smov 0  }
   0x3 LB: > { %s674_s16 = sadd.s32 4294967295, %s627_s15   ;;  %s408_s17 = sadd.s32 4294967294, %s627_s15   ;;  %s627_s15 = sphi %s659_s15, %s816_s15   ;;  %s623_s14 = sphi %s657_s14, %s815_s14   ;;  %s619_s13 = sphi %s655_s13, %s814_s13   ;;  %s615_s12 = sphi %s653_s12, %s813_s12  }
   0x4   : > { %s678_s18 = sadd.s32 1, %s627_s15   ;;  %s96_s19 = sadd.s32 1, %s623_s14 }
   0x5   : > { %s93_s20 = ssub.s32 %s627_s15, %s678_s18  ;;  %p106_p0 = scmp.ne.s32.totalorder %s623_s14, %s619_s13 }
   0x6   : > { %p94_p1 = scmp.eq.s32.totalorder %s93_s20, 0  ;;  %p107_p2 = scmp.eq.s32.totalorder %s674_s16, 2 }
   0x7   : > { %p112_p3 = scmp.ne.s32.totalorder %s619_s13, %s615_s12  ;;  %p113_p4 = scmp.eq.s32.totalorder %s408_s17, 2 }
   0x8   : > { %s689_s21 = scalar_select %p94_p1, %s623_s14, %s96_s19  }
   0x9   : > { %p691_p5 = por %p107_p2, %p106_p0  ;;  %p695_p6 = por %p113_p4, %p112_p3 }
   0xa   : > { %p411_p7 = scmp.ge.s32.totalorder %s627_s15, 1  ;;  %p149_p8 = scmp.lt.s32.totalorder %s627_s15, 4 }
   0xc   : > { %p150_p9 = pnand %p411_p7, %p149_p8 }
   0xd   : > { %s702_s24 = sshll.u32 (!%p150_p9), %s674_s16, 4  ;;  %v629_v0 = vmov (!%p150_p9), 0.0|0.0   ;;  %vm630_vm0 = vmmov (!%p150_p9), 0   ;;  %v631_v1 = vmov (!%p150_p9), 0.0   ;;  %vm202_vm1 = vcmask (!%p150_p9), 261120   ;;  %p181_p11 = scmp.lt.s32.totalorder (!%p150_p9), %s674_s16, 2 }
   0xe   : > { %153 = sbr.rel (%p150_p9) target bundleno = 345 (0x159), region = 32  ;;  %487 = vmatprep.subr.bf16.mxu0 (!%p150_p9), %v629_v0  ;;  %p176_p10 = scmp.lt.s32.totalorder (!%p150_p9), %s702_s24, 47  ;;  %484 = vmatprep.mubr.msk.f32.mxu0 (!%p150_p9), %vm630_vm0, %v631_v1  ;;  %vm715_vm2 = vmpackc.low (!%p150_p9), %vm202_vm1, %vm202_vm1  ;;  %v184_v27 = vld [vmem:[%s807_s2] sm:$0x1] (!%p150_p9) }
   0xf   : > { %s173_s8 = sand.u32 (!%p150_p9), 1, %s619_s13   ;;  %s763_s19 = scalar_lea.hbm (!%p150_p9), %s808_s3, %s702_s24 }
  0x10   : > { %s174_s9 = scalar_lea.vmem (!%p150_p9), [#allocation2], %s173_s8 }
  0x11   : > { %s344_s10 = sshll.u32 (!%p150_p9), %s174_s9, 4  ;;  %s765_s10 = int_to_ptr.vmem [resolvable:$true] %s344_s10 }
  0x12   : > { %s565_s20 = scalar_lea.vmem (!%p150_p9), %s765_s10, 16 }
  0x13   : > { %p566_p12 = scmp.ne.s32.totalorder (!%p150_p9), %s765_s10, %s565_s20 }
  0x15   : > { %s177_s25 = scalar_select %p176_p10, %s702_s24, 47 }
  0x16   : > { %s818_s16 = smov (!%p181_p11, %s674_s16), 2  ;;  %p567_p13 = pnand %p566_p12, %p691_p5 }
  0x17   : > { %s413_s26 = sshll.u32 %s177_s25, 3  ;;  %s183_s7 = scalar_lea.vmem %s806_s1, %s818_s16 }
  0x18   : > { %s709_s29 = scalar_lea.vmem %s805_s0, %s413_s26  ;;  %v201_v28 = vld [vmem:[%s183_s7] sm:$0x1]  ;;  %s332_s16 = scalar_lea.sflag [#allocation3], %s173_s8 }
  0x19   : > { %v185_v2 = vld [vmem:[%s709_s29] sm:$0xff]  ;;  %v186_v3 = vld [vmem:[%s709_s29 + $0x8] sm:$0xff]  ;;  %v187_v6 = vld [vmem:[%s709_s29 + $0x10] sm:$0xff]  ;;  %p568_p0 = pneg %p567_p13  ;;  %s632_s25 = smov [#allocation2]  }
  0x1a   : > { %v488_v5 = vpack.c.bf16 %v186_v3, %v185_v2  ;;  %v188_v7 = vld [vmem:[%s709_s29 + $0x18] sm:$0xff]  ;;  %v189_v9 = vld [vmem:[%s709_s29 + $0x20] sm:$0xff]  ;;  %v190_v10 = vld [vmem:[%s709_s29 + $0x28] sm:$0xff]  ;;  %s569_s26 = sshll.u32 %s632_s25, 4  ;;  %s570_s26 = int_to_ptr.vmem [resolvable:$false] %s569_s26 }
  0x1b   : > { %v492_v8 = vpack.c.bf16 %v188_v7, %v187_v6  ;;  %v496_v11 = vpack.c.bf16 %v190_v10, %v189_v9  ;;  %v191_v12 = vld [vmem:[%s709_s29 + $0x30] sm:$0xff]  ;;  %v192_v13 = vld [vmem:[%s709_s29 + $0x38] sm:$0xff]  ;;  %v193_v15 = vld [vmem:[%s709_s29 + $0x40] sm:$0xff]  ;;  %s571_s27 = scalar_lea.vmem %s570_s26, 32  ;;  %p572_p1 = scmp.lt.s32.totalorder %s765_s10, %s570_s26 }
  0x1c   : > { %490 = vmatpush3.bf16.xpose.msk.msra.mxu0 %vm715_vm2, %v488_v5  ;;  %v500_v14 = vpack.c.bf16 %v192_v13, %v191_v12  ;;  %v194_v16 = vld [vmem:[%s709_s29 + $0x48] sm:$0xff]  ;;  %v195_v18 = vld [vmem:[%s709_s29 + $0x50] sm:$0xff]  ;;  %v196_v19 = vld [vmem:[%s709_s29 + $0x58] sm:$0xff]  ;;  %p573_p2 = scmp.lt.s32.totalorder %s571_s27, %s565_s20 }
  0x1d   : > { %491 = vmatprep.subr.bf16.mxu0 %v629_v0  ;;  %v504_v17 = vpack.c.bf16 %v194_v16, %v193_v15  ;;  %v508_v20 = vpack.c.bf16 %v196_v19, %v195_v18  ;;  %v197_v21 = vld [vmem:[%s709_s29 + $0x60] sm:$0xff]  ;;  %v198_v22 = vld [vmem:[%s709_s29 + $0x68] sm:$0xff]  ;;  %v199_v24 = vld [vmem:[%s709_s29 + $0x70] sm:$0xff] }
  0x1e   : > { %v512_v23 = vpack.c.bf16 %v198_v22, %v197_v21  ;;  %v200_v25 = vld [vmem:[%s709_s29 + $0x78] sm:$0xff]  ;;  %p574_p3 = por %p573_p2, %p572_p1 }
  0x1f   : > { %v516_v26 = vpack.c.bf16 %v200_v25, %v199_v24 }
  0x20   : > { %p575_p4 = pnand %p574_p3, %p568_p0 }
  0x24   : > { %494 = vmatpush3.bf16.xpose.msk.msra.mxu0 %vm715_vm2, %v492_v8 }
  0x25   : > { %495 = vmatprep.subr.bf16.mxu0 %v629_v0 }
  0x2c   : > { %498 = vmatpush3.bf16.xpose.msk.msra.mxu0 %vm715_vm2, %v496_v11 }
  0x2d   : > { %499 = vmatprep.subr.bf16.mxu0 %v629_v0 }
  0x34   : > { %502 = vmatpush3.bf16.xpose.msk.msra.mxu0 %vm715_vm2, %v500_v14 }
  0x35   : > { %503 = vmatprep.subr.bf16.mxu0 %v629_v0 }
  0x3c   : > { %506 = vmatpush3.bf16.xpose.msk.msra.mxu0 %vm715_vm2, %v504_v17 }
  0x3d   : > { %507 = vmatprep.subr.bf16.mxu0 %v629_v0 }
  0x44   : > { %510 = vmatpush3.bf16.xpose.msk.msra.mxu0 %vm715_vm2, %v508_v20 }
  0x45   : > { %511 = vmatprep.subr.bf16.mxu0 %v629_v0 }
  0x4c   : > { %514 = vmatpush3.bf16.xpose.msk.msra.mxu0 %vm715_vm2, %v512_v23 }
  0x4d   : > { %515 = vmatprep.subr.bf16.mxu0 %v629_v0 }
  0x54   : > { %518 = vmatpush3.bf16.xpose.msk.msra.mxu0 %vm715_vm2, %v516_v26 }
  0x5b   : > { %485 = vmatmul.mubr.msk.f32.vlgmr.msra.gmra.mrb[0].mxu0 %vm202_vm1, %v184_v27 }
 0x12e   : > { %v320_v29 = vpop.f32.mrb[0].mxu0 }
 0x12f   : > { %v321_v30 = vadd.f32 %v320_v29, %v201_v28  ;;  %v486_v31 = vpop.f32.mrb[1].mxu0 }
 0x131   : > { %v431_v32 = vmul.f32 -1.442695, %v321_v30 }
 0x133   : > { %561 = vpow2.f32 %v431_v32 }
 0x13d   : > { %v562_v33 = vpop.eup %561 }
 0x13e   : > { %v327_v34 = vadd.f32 1.0, %v562_v33 }
 0x140   : > { %563 = vrcp.f32 %v327_v34 }
 0x14a   : > { %v564_v35 = vpop.eup %563 }
 0x14b   : > { %330 = vst [vmem:[%s174_s9] sm:$0x1] %v564_v35 }
 0x14c   : > { %578 = shalt.err (!%p575_p4)
}
 0x14d   : > { %s579_s24 = scalar_lea.hbm %s763_s19, 16  ;;  %s583_s30 = scalar_lea.hbm %s808_s3, 48 }
 0x14e   : > { %p580_p7 = scmp.ne.s32.totalorder %s763_s19, %s579_s24  ;;  %p584_p10 = scmp.lt.u32.totalorder %s763_s19, %s808_s3 }
 0x14f   : > { %p585_p11 = scmp.lt.u32.totalorder %s583_s30, %s579_s24  ;;  %p587_p13 = scmp.lt.u32.totalorder %s579_s24, %s763_s19 }
 0x150   : > { %p581_p8 = pnand %p580_p7, %p691_p5 }
 0x151   : > { %p586_p12 = por %p585_p11, %p584_p10 }
 0x152   : > { %p582_p9 = pneg %p581_p8 }
 0x153   : > { %p588_p0 = por %p587_p13, %p586_p12 }
 0x155   : > { %p589_p1 = pnand %p588_p0, %p582_p9 }
 0x157   : > { %592 = shalt.err (!%p589_p1)
}
 0x158   : > { %519 = dma.vmem_to_hbm [thread:$0]  (%p691_p5), %s765_s10, 16, %s763_s19, %s332_s16  }
 0x159 PF: > { %p525_p2 = scmp.ge.s32.totalorder %s627_s15, 2  ;;  %s356_s6 = sand.u32 1, %s615_s12  }
 0x15a   : > { %s357_s7 = scalar_lea.sflag [#allocation3], %s356_s6 }
 0x15b   : > { %p522_p3 = pnand %p525_p2, %p695_p6 }
 0x15d   : > { %610 = dma.done.wait (!%p522_p3), %s357_s7, 16  }
 0x15e   : > { %612 = vsyncadd (!%p522_p3), %s357_s7, 4294967280  ;;  %p13_p4 = scmp.ge.s32.totalorder %s678_s18, 5   ;;  %s813_s12 = smov %s619_s13 }
 0x15f   : > { %s814_s13 = smov %s623_s14  ;;  %s815_s14 = smov %s689_s21 }
 0x160   : > { %s816_s15 = smov %s678_s18  ;;  %15 = sbr.rel (!%p13_p4) target bundleno = 3 (0x3), region = 70 }
 0x167   :  { %361 = vsyncpa [#allocation3], 1 }
 0x168   :  { %363 = vsyncpa [#allocation3 + $0x1], 1 }

</bundles_post_ra>
